<compile_context>
chip_gen: v7x
topology: tpu7x:2x2x1
jax: 0.10.0
libtpu: 0.0.40
codegen_flags: <defaults>
</compile_context>

<pallas_src>
import functools
import math

import jax
import jax.numpy as jnp
from jax.experimental import pallas as pl
from jax.experimental.pallas import tpu as pltpu


# ----------------------------------------------------------------------------
# Pallas kernel 1: dense linear layer  out = x @ W + b        (row-tiled)
# ----------------------------------------------------------------------------
def _linear_kernel(x_ref, w_ref, b_ref, o_ref):
    acc = jnp.dot(x_ref[...], w_ref[...], preferred_element_type=jnp.float32)
    o_ref[...] = (acc + b_ref[...]).astype(o_ref.dtype)


def linear_pallas(x, w, b, *, tile_rows=256):
    """x: (N, K), w: (K, M), b: (M,) -> (N, M) f32.  bf16 MXU operands."""
    N, K = x.shape
    M = w.shape[1]
    tr = N if N <= tile_rows else tile_rows
    return pl.pallas_call(
        _linear_kernel,
        out_shape=jax.ShapeDtypeStruct((N, M), jnp.float32),
        grid=(pl.cdiv(N, tr),),
        in_specs=[
            pl.BlockSpec((tr, K), lambda i: (i, 0)),
            pl.BlockSpec((K, M), lambda i: (0, 0)),
            pl.BlockSpec((1, M), lambda i: (0, 0)),
        ],
        out_specs=pl.BlockSpec((tr, M), lambda i: (i, 0)),
        compiler_params=pltpu.CompilerParams(dimension_semantics=("parallel",)),
    )(x.astype(jnp.bfloat16), w.astype(jnp.bfloat16),
      b.reshape(1, M).astype(jnp.float32))


# ----------------------------------------------------------------------------
# Pallas kernel 2: fused linear + tanh + residual + per-row mask
#   out = (res + tanh(x @ W + b)) * row_mask
# ----------------------------------------------------------------------------
def _linear_tanh_res_kernel(x_ref, w_ref, b_ref, r_ref, m_ref, o_ref):
    acc = jnp.dot(x_ref[...], w_ref[...], preferred_element_type=jnp.float32)
    acc = acc + b_ref[...]
    o_ref[...] = ((r_ref[...] + jnp.tanh(acc)) * m_ref[...]).astype(o_ref.dtype)


def linear_tanh_residual_pallas(x, w, b, res, row_mask, *, tile_rows=256):
    N, K = x.shape
    M = w.shape[1]
    tr = N if N <= tile_rows else tile_rows
    return pl.pallas_call(
        _linear_tanh_res_kernel,
        out_shape=jax.ShapeDtypeStruct((N, M), jnp.float32),
        grid=(pl.cdiv(N, tr),),
        in_specs=[
            pl.BlockSpec((tr, K), lambda i: (i, 0)),
            pl.BlockSpec((K, M), lambda i: (0, 0)),
            pl.BlockSpec((1, M), lambda i: (0, 0)),
            pl.BlockSpec((tr, M), lambda i: (i, 0)),
            pl.BlockSpec((tr, 1), lambda i: (i, 0)),
        ],
        out_specs=pl.BlockSpec((tr, M), lambda i: (i, 0)),
        compiler_params=pltpu.CompilerParams(dimension_semantics=("parallel",)),
    )(x.astype(jnp.bfloat16), w.astype(jnp.bfloat16),
      b.reshape(1, M).astype(jnp.float32),
      res.astype(jnp.float32), row_mask.astype(jnp.float32))


# ----------------------------------------------------------------------------
# Pallas kernel 3: fused GraphWriter output head over flattened rows.
#   p        = sigmoid(dec @ w_switch + b_switch)
#   select_v = softmax(dec @ W_vocab + b_vocab)
#   select_e = softmax((dec @ (W_sel/sqrt(d))) @ ent_nodes^T)   (per batch)
#   out      = [select_v * (1-p) | select_e * p] + 1e-6   (one lane-dense block)
# ----------------------------------------------------------------------------
def _head_kernel(dec_ref, ent_ref, wsw_ref, bsw_ref, wv_ref, bv_ref, wsel_ref,
                 o_ref, *, y_len):
    dec = dec_ref[...]                                  # (tr, d) bf16
    tr, d = dec.shape
    tb = tr // y_len
    vme = wv_ref.shape[1]

    # switch gate (MXU, 1-column output)
    p_logit = jnp.dot(dec, wsw_ref[...], preferred_element_type=jnp.float32)
    p = jax.nn.sigmoid(p_logit + bsw_ref[...])          # (tr, 1) f32

    # vocabulary softmax (f32 math, bf16 MXU operands)
    lv = jnp.dot(dec, wv_ref[...], preferred_element_type=jnp.float32) + bv_ref[...]
    lv = lv - jnp.max(lv, axis=-1, keepdims=True)
    ev = jnp.exp(lv)
    sv = ev * pl.reciprocal(jnp.sum(ev, axis=-1, keepdims=True), approx=True)

    # entity-selection attention; W_sel pre-scaled by 1/sqrt(d) offline.
    # TODO(synk): exact EntitySelector internals unavailable; bilinear attention used.
    q = jnp.dot(dec, wsel_ref[...], preferred_element_type=jnp.float32)      # (tr, d)
    qb = q.reshape(tb, y_len, d).astype(jnp.bfloat16)
    le = jnp.einsum('byd,bed->bye', qb, ent_ref[...],
                    preferred_element_type=jnp.float32)                       # (tb, y, E)
    le = le - jnp.max(le, axis=-1, keepdims=True)
    ee = jnp.exp(le)
    se = ee * pl.reciprocal(jnp.sum(ee, axis=-1, keepdims=True), approx=True)
    se = se.reshape(tr, -1)                                                   # (tr, E)

    # single (tr, V) output block; +1e-6 epilogue folded in (commutes with the
    # final sort_idx permutation done in the wrapper).
    o_ref[:, :vme] = (sv * (1.0 - p) + 1e-6).astype(o_ref.dtype)
    o_ref[:, vme:] = (se * p + 1e-6).astype(o_ref.dtype)


def output_head(dec_out, ent_nodes, w_switch, b_switch, w_vocab, b_vocab, w_sel):
    bsz, y_len, d_model = dec_out.shape
    E = ent_nodes.shape[1]
    VmE = w_vocab.shape[1]
    V = VmE + E
    R = bsz * y_len

    # whole-batch row tiles, targeting MXU-sized M (up to ~256 rows per tile)
    tile_b = min(bsz, max(1, 256 // max(y_len, 1)))
    while tile_b > 1 and (bsz % tile_b != 0 or (tile_b * y_len) % 8 != 0):
        tile_b -= 1
    if bsz % tile_b != 0 or ((tile_b * y_len) % 8 != 0 and tile_b != bsz):
        tile_b = bsz
    tile_r = tile_b * y_len
    grid = (bsz // tile_b,)

    dec_flat = dec_out.reshape(R, d_model).astype(jnp.bfloat16)
    ent_b = ent_nodes.astype(jnp.bfloat16)
    wsw = w_switch.reshape(d_model, 1).astype(jnp.bfloat16)
    bsw = b_switch.reshape(1, 1).astype(jnp.float32)
    wv = w_vocab.astype(jnp.bfloat16)
    bv = b_vocab.reshape(1, VmE).astype(jnp.float32)
    wsel = (w_sel * (1.0 / math.sqrt(d_model))).astype(jnp.bfloat16)

    kernel = functools.partial(_head_kernel, y_len=y_len)
    out = pl.pallas_call(
        kernel,
        out_shape=jax.ShapeDtypeStruct((R, V), jnp.float32),
        grid=grid,
        in_specs=[
            pl.BlockSpec((tile_r, d_model), lambda r: (r, 0)),
            pl.BlockSpec((tile_b, E, d_model), lambda r: (r, 0, 0)),
            pl.BlockSpec((d_model, 1), lambda r: (0, 0)),
            pl.BlockSpec((1, 1), lambda r: (0, 0)),
            pl.BlockSpec((d_model, VmE), lambda r: (0, 0)),
            pl.BlockSpec((1, VmE), lambda r: (0, 0)),
            pl.BlockSpec((d_model, d_model), lambda r: (0, 0)),
        ],
        out_specs=pl.BlockSpec((tile_r, V), lambda r: (r, 0)),
        compiler_params=pltpu.CompilerParams(dimension_semantics=("parallel",)),
    )(dec_flat, ent_b, wsw, bsw, wv, bv, wsel)
    return out.reshape(bsz, y_len, V)


# ----------------------------------------------------------------------------
# GraphWriter forward (JAX glue around the Pallas kernels)
# ----------------------------------------------------------------------------
def graphwriter_forward(params, ent_names, ent_lens, rels, ent_idx, rel_idx,
                        glob_idx, decoder_inp, ent_idx_b, sort_idx):
    d_model = params["W_emb"].shape[1]
    bsz, y_len = decoder_inp.shape

    # Pre-project the 300-d GloVe table through emb_ln once; Emb.forward then
    # becomes a plain gather (removes the K=300 lane padding from the hot path).
    # TODO(synk): GloVe-840B-300d table replaced by a deterministic random table.
    proj_table = linear_pallas(params["emb_table"], params["W_emb"], params["b_emb"])

    # StringEncoder stand-in: masked mean pool of projected name tokens
    # (mean commutes with the affine emb_ln, so this equals pool-then-project).
    # TODO(synk): original StringEncoder (recurrent name encoder) not provided.
    name_e = proj_table[ent_names]                         # (num_ent, name_len, d)
    mask = (jnp.arange(ent_names.shape[1])[None, :] < ent_lens[:, None]).astype(jnp.float32)
    ent_emb = (name_e * mask[..., None]).sum(1) / jnp.maximum(mask.sum(1, keepdims=True), 1.0)

    rel_emb = proj_table[rels]                             # (num_rel, d)
    glob_emb = jnp.broadcast_to(params["glob"][None, :], (bsz, d_model))

    embs = jnp.concatenate([ent_emb, rel_emb, glob_emb], axis=0)
    idxs = jnp.concatenate([ent_idx, rel_idx, glob_idx], axis=0)
    # PyTorch: _, idxs = sort(idxs); x = embs[idxs]  ==  scatter x[idxs0[j]] = embs[j],
    # implemented as a gather with the inverse permutation.
    node_x = embs[jnp.argsort(idxs)]

    # GraphEncoder stand-in: per-node linear + tanh + residual (fused kernel).
    # TODO(synk): original 6-layer DGL graph transformer not provided; edges ignored.
    n_nodes = node_x.shape[0]
    node_emb = linear_tanh_residual_pallas(node_x, params["W_g"], params["b_g"],
                                           node_x, jnp.ones((n_nodes, 1), jnp.float32))

    y_emb = proj_table[decoder_inp]                        # (bsz, y_len, d)

    # Decoder stand-in: masked residual linear + tanh (fused kernel).
    # TODO(synk): original 4-layer transformer decoder w/ EntitySelector layer not provided.
    y_flat = y_emb.reshape(bsz * y_len, d_model)
    pad_mask = (decoder_inp != 0).astype(jnp.float32).reshape(bsz * y_len, 1)
    output = linear_tanh_residual_pallas(y_flat, params["W_dec"], params["b_dec"],
                                         y_flat, pad_mask).reshape(bsz, y_len, d_model)

    # per-batch entity node embeddings (gather glue)
    ent_nodes = node_emb[ent_idx_b]                        # (bsz, entity_number, d)

    head = output_head(output, ent_nodes,
                       params["w_switch"], params["b_switch"],
                       params["W_vocab"], params["b_vocab"], params["W_sel"])

    # out[:, :, sort_idx]; +1e-6 already folded into the head kernel epilogue.
    # TODO(synk): the vocab-column part of this permutation could be folded into
    # W_vocab offline, but entity columns are interleaved so the gather remains.
    return jnp.take(head, sort_idx, axis=-1)


# ----------------------------------------------------------------------------
# Deterministic parameter init + small example run
# ----------------------------------------------------------------------------
def xavier(key, shape):
    fan_in, fan_out = shape
    std = math.sqrt(2.0 / (fan_in + fan_out))
    return jax.random.normal(key, shape, jnp.float32) * std


if __name__ == "__main__":
    V = 256               # len(vocab)
    ENT_NUM = 64          # entity_number
    D = 128               # d_model
    GLOVE_D = 300
    BSZ, Y_LEN = 2, 8
    NUM_ENT, NAME_LEN, NUM_REL = 6, 5, 4

    key = jax.random.PRNGKey(0)
    ks = jax.random.split(key, 16)

    params = {
        "emb_table": jax.random.normal(ks[0], (V, GLOVE_D), jnp.float32) * 0.1,
        "W_emb": xavier(ks[1], (GLOVE_D, D)),
        "b_emb": jnp.zeros((D,), jnp.float32),
        "W_g": xavier(ks[2], (D, D)),
        "b_g": jnp.zeros((D,), jnp.float32),
        "W_dec": xavier(ks[3], (D, D)),
        "b_dec": jnp.zeros((D,), jnp.float32),
        "w_switch": xavier(ks[4], (1, D)),
        "b_switch": jnp.zeros((1, 1), jnp.float32),
        "W_vocab": xavier(ks[5], (D, V - ENT_NUM)),
        "b_vocab": jnp.zeros((V - ENT_NUM,), jnp.float32),
        "W_sel": xavier(ks[6], (D, D)),
        "glob": jax.random.normal(ks[7], (D,), jnp.float32) * 0.01,
    }

    ent_names = jax.random.randint(ks[8], (NUM_ENT, NAME_LEN), 1, V, jnp.int32)
    ent_lens = jax.random.randint(ks[9], (NUM_ENT,), 1, NAME_LEN + 1, jnp.int32)
    rels = jax.random.randint(ks[10], (NUM_REL,), 1, V, jnp.int32)
    ent_idx = jnp.arange(NUM_ENT, dtype=jnp.int32)
    rel_idx = jnp.arange(NUM_ENT, NUM_ENT + NUM_REL, dtype=jnp.int32)
    glob_idx = jnp.arange(NUM_ENT + NUM_REL, NUM_ENT + NUM_REL + BSZ, dtype=jnp.int32)
    decoder_inp = jax.random.randint(ks[11], (BSZ, Y_LEN), 0, V, jnp.int32)
    decoder_inp = decoder_inp.at[:, 0].set(1)              # sos token
    ent_idx_b = (jnp.arange(BSZ * ENT_NUM, dtype=jnp.int32) % NUM_ENT).reshape(BSZ, ENT_NUM)
    sort_idx = jax.random.permutation(ks[12], V).astype(jnp.int32)

    out = graphwriter_forward(params, ent_names, ent_lens, rels, ent_idx, rel_idx,
                              glob_idx, decoder_inp, ent_idx_b, sort_idx)
    jax.block_until_ready(out)

    assert out.shape == (BSZ, Y_LEN, V), out.shape
    assert bool(jnp.all(jnp.isfinite(out)))
    print("KERNEL_OK")
</pallas_src>

<mosaic_0001>
module attributes {stable_mosaic.version = 11 : i64} {
  func.func @_linear_kernel(%arg0: i32, %arg1: memref<256x300xbf16, #tpu.memory_space<vmem>>, %arg2: memref<300x128xbf16, #tpu.memory_space<vmem>>, %arg3: memref<1x128xf32, #tpu.memory_space<vmem>>, %arg4: memref<256x128xf32, #tpu.memory_space<vmem>>) attributes {dimension_semantics = [#tpu.dimension_semantics<parallel>], iteration_bounds = array<i64: 1>, scalar_prefetch = 0 : i64, scratch_operands = 0 : i64, tpu.core_type = #tpu.core_type<tc>, window_params = [{transform_indices = @transform_0, window_bounds = array<i64: 256, 300>}, {pipeline_mode = #tpu.pipeline_mode<synchronous>, transform_indices = @transform_1, window_bounds = array<i64: 300, 128>}, {pipeline_mode = #tpu.pipeline_mode<synchronous>, transform_indices = @transform_2, window_bounds = array<i64: 1, 128>}, {transform_indices = @transform_3, window_bounds = array<i64: 256, 128>}]} {
    %c0 = arith.constant 0 : index
    %c0_0 = arith.constant 0 : index
    %0 = vector.load %arg1[%c0, %c0_0] : memref<256x300xbf16, #tpu.memory_space<vmem>>, vector<256x300xbf16>
    %c0_1 = arith.constant 0 : index
    %c0_2 = arith.constant 0 : index
    %1 = vector.load %arg2[%c0_1, %c0_2] : memref<300x128xbf16, #tpu.memory_space<vmem>>, vector<300x128xbf16>
    %cst = arith.constant dense<0.000000e+00> : vector<256x128xf32>
    %2 = tpu.matmul %0, %1, %cst {dimension_numbers = #tpu.dot_dimension_numbers<[1], [0], [0], [1], [0, 0, 1, 1], [], []>} : vector<256x300xbf16>, vector<300x128xbf16>, vector<256x128xf32> -> vector<256x128xf32>
    %c0_3 = arith.constant 0 : index
    %c0_4 = arith.constant 0 : index
    %3 = vector.load %arg3[%c0_3, %c0_4] : memref<1x128xf32, #tpu.memory_space<vmem>>, vector<1x128xf32>
    %4 = vector.broadcast %3 : vector<1x128xf32> to vector<256x128xf32>
    %5 = arith.addf %2, %4 : vector<256x128xf32>
    %c0_5 = arith.constant 0 : index
    %c0_6 = arith.constant 0 : index
    %6 = vector.load %arg4[%c0_5, %c0_6] : memref<256x128xf32, #tpu.memory_space<vmem>>, vector<256x128xf32>
    tpu.vector_store %arg4[%c0_5, %c0_6], %5 {strides = array<i32>} : memref<256x128xf32, #tpu.memory_space<vmem>>, vector<256x128xf32>,
    return
  }
  func.func @transform_0(%arg0: i32) -> (i32, i32) {
    %c0_i32 = arith.constant 0 : i32
    %c0_i32_0 = arith.constant 0 : i32
    return %arg0, %c0_i32 : i32, i32
  }
  func.func @transform_1(%arg0: i32) -> (i32, i32) {
    %c0_i32 = arith.constant 0 : i32
    %c0_i32_0 = arith.constant 0 : i32
    %c0_i32_1 = arith.constant 0 : i32
    return %c0_i32, %c0_i32_0 : i32, i32
  }
  func.func @transform_2(%arg0: i32) -> (i32, i32) {
    %c0_i32 = arith.constant 0 : i32
    %c0_i32_0 = arith.constant 0 : i32
    %c0_i32_1 = arith.constant 0 : i32
    return %c0_i32, %c0_i32_0 : i32, i32
  }
  func.func @transform_3(%arg0: i32) -> (i32, i32) {
    %c0_i32 = arith.constant 0 : i32
    %c0_i32_0 = arith.constant 0 : i32
    return %arg0, %c0_i32 : i32, i32
  }
}

</mosaic_0001>

<bundles_post_ra>
// kernel: tpu_custom_call.1
= control target key start
LH: loop header
LB: loop body
LE: loop exit
PB: predicated region body
PF: predicated region fallthrough
CT: control target
= control target key end

     0   :  { %vm527_vm0 = vcmask 1045504   ;;  %vm478_vm1 = vcmask 359424   ;;  %s1600_s0 = inlined_call_operand.vmem [shape: bf16[256,300], index: 0, kind: input, shape index: {}]   ;;  %s1601_s1 = inlined_call_operand.vmem [shape: bf16[300,128], index: 1, kind: input, shape index: {}]   ;;  %s1602_s2 = inlined_call_operand.vmem [shape: f32[1,128], index: 2, kind: input, shape index: {}]   ;;  %s1603_s3 = inlined_call_operand.hbm [shape: f32[256,128], index: 3, kind: output, shape index: {}]  }
   0x1   :  { %v1174_v0 = vld [vmem:[%s1601_s1 + $0x40] sm:$0xff]   ;;  %v1176_v2 = vld [vmem:[%s1601_s1 + $0x48] sm:$0xff]   ;;  %v1178_v4 = vld [vmem:[%s1601_s1 + $0x50] sm:$0xff]  }
   0x2   :  { %v1175_v1 = vld [vmem:[%s1601_s1] sm:$0xff]   ;;  %985 = vmatprep.subr.bf16.mxu0 %v1174_v0  ;;  %1154 = vmatprep.subr.bf16.mxu1 %v1174_v0  ;;  %v1177_v3 = vld [vmem:[%s1601_s1 + $0x8] sm:$0xff]   ;;  %v1179_v5 = vld [vmem:[%s1601_s1 + $0x10] sm:$0xff]  }
   0x3   :  { %986 = vmatpush3.bf16.msra.mxu0 %v1175_v1  ;;  %1162 = vmatpush3.bf16.msra.mxu1 %v1175_v1  ;;  %v1180_v6 = vld [vmem:[%s1601_s1 + $0x58] sm:$0xff]   ;;  %v1182_v8 = vld [vmem:[%s1601_s1 + $0x60] sm:$0xff]   ;;  %v1184_v10 = vld [vmem:[%s1601_s1 + $0x68] sm:$0xff]  }
   0x4   :  { %987 = vmatprep.subr.bf16.mxu0 %v1176_v2  ;;  %1155 = vmatprep.subr.bf16.mxu1 %v1176_v2  ;;  %v1181_v7 = vld [vmem:[%s1601_s1 + $0x18] sm:$0xff]   ;;  %v1183_v9 = vld [vmem:[%s1601_s1 + $0x20] sm:$0xff]   ;;  %v1185_v13 = vld [vmem:[%s1601_s1 + $0x28] sm:$0xff]  }
   0x5   :  { %v1192_v11 = vld [vmem:[%s1600_s0 + $0x4] ss:$12 sps:$4 sm:$0xff]   ;;  %v1188_v16 = vld [vmem:[%s1601_s1 + $0x78] sm:$0xff]   ;;  %v1190_v18 = vld [vmem:[%s1600_s0] ss:$12 sps:$4 sm:$0xff]  }
   0x6   :  { %v1195_v12 = vld [vmem:[%s1600_s0 + $0x124] ss:$12 sps:$4 sm:$0xff]   ;;  %563 = vmatprep.mubr.bf16.mxu0 %v1192_v11  ;;  %v1189_v17 = vld [vmem:[%s1601_s1 + $0x38] sm:$0xff]   ;;  %v1193_v20 = vld [vmem:[%s1600_s0 + $0x120] ss:$12 sps:$4 sm:$0xff]  }
   0x7   :  { %988 = vmatpush3.bf16.msra.mxu0 %v1177_v3  ;;  %1163 = vmatpush3.bf16.msra.mxu1 %v1177_v3  ;;  %v1186_v14 = vld [vmem:[%s1601_s1 + $0x70] sm:$0xff]   ;;  %v1196_v19 = vld [vmem:[%s1601_s1 + $0x80] sm:$0xff]   ;;  %v1197_v21 = vld [vmem:[%s1600_s0 + $0x1c] ss:$12 sps:$4 sm:$0xff]  }
   0x8   :  { %989 = vmatprep.subr.bf16.mxu0 %v1178_v4  ;;  %1156 = vmatprep.subr.bf16.mxu1 %v1178_v4  ;;  %v1187_v15 = vld [vmem:[%s1601_s1 + $0x30] sm:$0xff]   ;;  %v1199_v22 = vld [vmem:[%s1600_s0 + $0x13c] ss:$12 sps:$4 sm:$0xff]   ;;  %v1201_v25 = vld [vmem:[%s1600_s0 + $0x18] ss:$12 sps:$4 sm:$0xff]  }
   0x9   :  { %659 = vmatprep.mubr.bf16.mxu1 %v1195_v12  ;;  %v1203_v23 = vld [vmem:[%s1601_s1 + $0x88] sm:$0xff]   ;;  %v1216_v24 = vld [vmem:[%s1601_s1 + $0x90] sm:$0x3f]   ;;  %v1202_v26 = vld [vmem:[%s1600_s0 + $0x138] ss:$12 sps:$4 sm:$0xff]  }
   0xa   :  { %v1204_v27 = vld [vmem:[%s1600_s0 + $0x34] ss:$12 sps:$4 sm:$0xff]   ;;  %v529_v29 = vsel %vm527_vm0, %v1216_v24, 0  ;;  %v1208_v30 = vld [vmem:[%s1600_s0 + $0x30] ss:$12 sps:$4 sm:$0xff]  }
   0xb   :  { %990 = vmatpush3.bf16.msra.mxu0 %v1179_v5  ;;  %1164 = vmatpush3.bf16.msra.mxu1 %v1179_v5  ;;  %v1206_v28 = vld [vmem:[%s1600_s0 + $0x154] ss:$12 sps:$4 sm:$0xff]   ;;  %v1209_v31 = vld [vmem:[%s1600_s0 + $0x150] ss:$12 sps:$4 sm:$0xff]   ;;  %v1210_v32 = vld [vmem:[%s1600_s0 + $0x4c] ss:$12 sps:$4 sm:$0xff]  }
   0xc   :  { %991 = vmatprep.subr.bf16.mxu0 %v1180_v6  ;;  %1157 = vmatprep.subr.bf16.mxu1 %v1180_v6  ;;  %v1212_v33 = vld [vmem:[%s1600_s0 + $0x16c] ss:$12 sps:$4 sm:$0xff]   ;;  %v1214_v34 = vld [vmem:[%s1600_s0 + $0x48] ss:$12 sps:$4 sm:$0xff]   ;;  %v1217_v36 = vld [vmem:[%s1600_s0 + $0x64] ss:$12 sps:$4 sm:$0xff]  }
   0xd   :  { %v1215_v35 = vld [vmem:[%s1600_s0 + $0x168] ss:$12 sps:$4 sm:$0xff]  }
   0xe   :  { %v1219_v37 = vld [vmem:[%s1600_s0 + $0x8] ss:$12 sps:$4 sm:$0xff]  }
   0xf   :  { %992 = vmatpush3.bf16.msra.mxu0 %v1181_v7  ;;  %1165 = vmatpush3.bf16.msra.mxu1 %v1181_v7 }
  0x10   :  { %993 = vmatprep.subr.bf16.mxu0 %v1182_v8  ;;  %1158 = vmatprep.subr.bf16.mxu1 %v1182_v8 }
  0x13   :  { %994 = vmatpush3.bf16.msra.mxu0 %v1183_v9  ;;  %1166 = vmatpush3.bf16.msra.mxu1 %v1183_v9 }
  0x14   :  { %995 = vmatprep.subr.bf16.mxu0 %v1184_v10  ;;  %1159 = vmatprep.subr.bf16.mxu1 %v1184_v10 }
  0x17   :  { %996 = vmatpush3.bf16.msra.mxu0 %v1185_v13  ;;  %1167 = vmatpush3.bf16.msra.mxu1 %v1185_v13 }
  0x18   :  { %997 = vmatprep.subr.bf16.mxu0 %v1186_v14  ;;  %1160 = vmatprep.subr.bf16.mxu1 %v1186_v14 }
  0x1b   :  { %998 = vmatpush3.bf16.msra.mxu0 %v1187_v15  ;;  %1168 = vmatpush3.bf16.msra.mxu1 %v1187_v15 }
  0x1c   :  { %999 = vmatprep.subr.bf16.mxu0 %v1188_v16  ;;  %1161 = vmatprep.subr.bf16.mxu1 %v1188_v16 }
  0x1f   :  { %1000 = vmatpush3.bf16.msra.mxu0 %v1189_v17  ;;  %1169 = vmatpush3.bf16.msra.mxu1 %v1189_v17 }
  0x20   :  { %1116 = vmatprep.subr.bf16.mxu1 %v1196_v19 }
  0x22   :  { %564 = vmatmul.mubr.bf16.vlgmr.msra.gmra.mrb[0].mxu0 %v1190_v18  ;;  %660 = vmatmul.mubr.bf16.vlgmr.msra.gmra.mrb[0].mxu1 %v1193_v20 }
  0x23   :  { %1117 = vmatpush3.bf16.msra.mxu1 %v1196_v19  ;;  %571 = vmatprep.mubr.bf16.mxu0 %v1197_v21 }
  0x24   :  { %667 = vmatprep.mubr.bf16.mxu1 %v1199_v22  ;;  %1118 = vmatprep.subr.bf16.mxu1 %v1203_v23 }
  0x27   :  { %1119 = vmatpush3.bf16.msra.mxu1 %v1203_v23 }
  0x28   :  { %1170 = vmatprep.subr.msk.bf16.mxu1 %vm527_vm0, %v1216_v24 }
  0x2a   :  { %572 = vmatmul.mubr.bf16.gmra.mrb[4].mxu0 %v1201_v25  ;;  %668 = vmatmul.mubr.bf16.gmra.mrb[4].mxu1 %v1202_v26 }
  0x2b   :  { %579 = vmatprep.mubr.bf16.mxu0 %v1204_v27  ;;  %675 = vmatprep.mubr.bf16.mxu1 %v1206_v28 }
  0x2c   :  { %1121 = vmatpush3.bf16.msra.mxu1 %v529_v29 }
  0x32   :  { %580 = vmatmul.mubr.bf16.gmra.mrb[8].mxu0 %v1208_v30  ;;  %676 = vmatmul.mubr.bf16.gmra.mrb[8].mxu1 %v1209_v31 }
  0x33   :  { %587 = vmatprep.mubr.bf16.mxu0 %v1210_v32  ;;  %683 = vmatprep.mubr.bf16.mxu1 %v1212_v33 }
  0x34   :  { %8 = vsyncpa [#allocation3], 0  ;;  %v1220_v38 = vld [vmem:[%s1600_s0 + $0x60] ss:$12 sps:$4 sm:$0xff]   ;;  %v1222_v40 = vld [vmem:[%s1600_s0 + $0x7c] ss:$12 sps:$4 sm:$0xff]  }
  0x35   :  { %v1221_v39 = vld [vmem:[%s1600_s0 + $0x20] ss:$12 sps:$4 sm:$0xff]   ;;  %v1224_v41 = vld [vmem:[%s1600_s0 + $0x38] ss:$12 sps:$4 sm:$0xff]   ;;  %v1226_v43 = vld [vmem:[%s1600_s0 + $0x50] ss:$12 sps:$4 sm:$0xff]  }
  0x36   :  { %v1225_v42 = vld [vmem:[%s1600_s0 + $0x78] ss:$12 sps:$4 sm:$0xff]   ;;  %v1227_v44 = vld [vmem:[%s1600_s0 + $0x94] ss:$12 sps:$4 sm:$0xff]   ;;  %v1230_v46 = vld [vmem:[%s1600_s0 + $0x90] ss:$12 sps:$4 sm:$0xff]  }
  0x37   :  { %v1229_v45 = vld [vmem:[%s1600_s0 + $0x68] ss:$12 sps:$4 sm:$0xff]   ;;  %v1231_v47 = vld [vmem:[%s1600_s0 + $0x80] ss:$12 sps:$4 sm:$0xff]   ;;  %v1234_v49 = vld [vmem:[%s1600_s0 + $0x98] ss:$12 sps:$4 sm:$0xff]  }
  0x38   :  { %v1232_v48 = vld [vmem:[%s1600_s0 + $0xac] ss:$12 sps:$4 sm:$0xff]   ;;  %v1235_v50 = vld [vmem:[%s1600_s0 + $0xa8] ss:$12 sps:$4 sm:$0xff]   ;;  %v1236_v51 = vld [vmem:[%s1600_s0 + $0xb0] ss:$12 sps:$4 sm:$0xff]  }
  0x39   :  { %v1237_v52 = vld [vmem:[%s1600_s0 + $0xc4] ss:$12 sps:$4 sm:$0xff]   ;;  %v1239_v53 = vld [vmem:[%s1600_s0 + $0xc8] ss:$12 sps:$4 sm:$0xff]   ;;  %v1240_v54 = vld [vmem:[%s1600_s0 + $0xc0] ss:$12 sps:$4 sm:$0xff]  }
  0x3a   :  { %588 = vmatmul.mubr.bf16.gmra.mrb[12].mxu0 %v1214_v34  ;;  %684 = vmatmul.mubr.bf16.gmra.mrb[12].mxu1 %v1215_v35  ;;  %v1241_v55 = vld [vmem:[%s1600_s0 + $0xe0] ss:$12 sps:$4 sm:$0xff]   ;;  %v1242_v56 = vld [vmem:[%s1600_s0 + $0xdc] ss:$12 sps:$4 sm:$0xff]   ;;  %v1244_v57 = vld [vmem:[%s1600_s0 + $0xf8] ss:$12 sps:$4 sm:$0xff]  }
  0x3b   :  { %595 = vmatprep.mubr.bf16.mxu0 %v1217_v36  ;;  %1122 = vmatprep.mubr.msk.bf16.mxu1 %vm478_vm1, %v1219_v37  ;;  %v1245_v58 = vld [vmem:[%s1600_s0 + $0xd8] ss:$12 sps:$4 sm:$0xff]   ;;  %v1246_v59 = vld [vmem:[%s1600_s0 + $0x110] ss:$12 sps:$4 sm:$0xff]   ;;  %v1247_v60 = vld [vmem:[%s1600_s0 + $0xf4] ss:$12 sps:$4 sm:$0xff]  }
  0x3c   :  { %v1249_v61 = vld [vmem:[%s1600_s0 + $0x128] ss:$12 sps:$4 sm:$0xff]   ;;  %v1250_v62 = vld [vmem:[%s1600_s0 + $0xf0] ss:$12 sps:$4 sm:$0xff]   ;;  %v1251_v63 = vld [vmem:[%s1600_s0 + $0x140] ss:$12 sps:$4 sm:$0xff]  }
  0x3d   :  { %v1252_v0 = vld [vmem:[%s1600_s0 + $0x10c] ss:$12 sps:$4 sm:$0xff]   ;;  %v1255_v2 = vld [vmem:[%s1600_s0 + $0x108] ss:$12 sps:$4 sm:$0xff]   ;;  %v1256_v3 = vld [vmem:[%s1600_s0 + $0x170] ss:$12 sps:$4 sm:$0xff]  }
  0x3e   :  { %v1254_v1 = vld [vmem:[%s1600_s0 + $0x158] ss:$12 sps:$4 sm:$0xff]  }
  0x42   :  { %596 = vmatmul.mubr.bf16.gmra.mrb[16].mxu0 %v1220_v38  ;;  %1123 = vmatmul.mubr.msk.bf16.vlgmr.msra.gmra.mrb[16].mxu1 %vm478_vm1, %v1221_v39 }
  0x43   :  { %603 = vmatprep.mubr.bf16.mxu0 %v1222_v40  ;;  %1126 = vmatprep.mubr.msk.bf16.mxu1 %vm478_vm1, %v1224_v41 }
  0x4a   :  { %604 = vmatmul.mubr.bf16.gmra.mrb[20].mxu0 %v1225_v42  ;;  %1127 = vmatmul.mubr.msk.bf16.gmra.mrb[20].mxu1 %vm478_vm1, %v1226_v43 }
  0x4b   :  { %611 = vmatprep.mubr.bf16.mxu0 %v1227_v44  ;;  %1130 = vmatprep.mubr.msk.bf16.mxu1 %vm478_vm1, %v1229_v45 }
  0x52   :  { %612 = vmatmul.mubr.bf16.gmra.mrb[24].mxu0 %v1230_v46  ;;  %1131 = vmatmul.mubr.msk.bf16.gmra.mrb[24].mxu1 %vm478_vm1, %v1231_v47 }
  0x53   :  { %619 = vmatprep.mubr.bf16.mxu0 %v1232_v48  ;;  %1134 = vmatprep.mubr.msk.bf16.mxu1 %vm478_vm1, %v1234_v49 }
  0x5a   :  { %620 = vmatmul.mubr.bf16.gmra.mrb[28].mxu0 %v1235_v50  ;;  %1135 = vmatmul.mubr.msk.bf16.gmra.mrb[28].mxu1 %vm478_vm1, %v1236_v51 }
  0x5b   :  { %627 = vmatprep.mubr.bf16.mxu0 %v1237_v52  ;;  %1138 = vmatprep.mubr.msk.bf16.mxu1 %vm478_vm1, %v1239_v53  ;;  %v1540_v52 = vld [vmem:[%s1602_s2] ss:$0 sm:$0xff]  ;;  %s1281_s2 = smov [#allocation2]  }
  0x5c   :  { %s890_s9 = sshll.u32 %s1281_s2, 4  ;;  %s891_s9 = int_to_ptr.vmem [resolvable:$true] %s890_s9 }
  0x5d   :  { %s1257_s10 = scalar_lea.vmem %s891_s9, 4096  ;;  %p1262_p1 = scmp.lt.s32.totalorder %s891_s9, %s891_s9 }
  0x5e   :  { %p1258_p0 = scmp.ne.s32.totalorder %s891_s9, %s1257_s10  ;;  %p1263_p2 = scmp.lt.s32.totalorder %s1257_s10, %s1257_s10 }
  0x60   :  { %p1264_p3 = por %p1263_p2, %p1262_p1 }
  0x62   :  { %628 = vmatmul.mubr.bf16.gmra.mrb[32].mxu0 %v1240_v54  ;;  %1139 = vmatmul.mubr.msk.bf16.gmra.mrb[32].mxu1 %vm478_vm1, %v1241_v55  ;;  %p1265_p4 = pnand %p1264_p3, %p1258_p0 }
  0x63   :  { %635 = vmatprep.mubr.bf16.mxu0 %v1242_v56  ;;  %1142 = vmatprep.mubr.msk.bf16.mxu1 %vm478_vm1, %v1244_v57 }
  0x6a   :  { %636 = vmatmul.mubr.bf16.gmra.mrb[36].mxu0 %v1245_v58  ;;  %1143 = vmatmul.mubr.msk.bf16.gmra.mrb[36].mxu1 %vm478_vm1, %v1246_v59 }
  0x6b   :  { %643 = vmatprep.mubr.bf16.mxu0 %v1247_v60  ;;  %1146 = vmatprep.mubr.msk.bf16.mxu1 %vm478_vm1, %v1249_v61 }
  0x72   :  { %644 = vmatmul.mubr.bf16.gmra.mrb[40].mxu0 %v1250_v62  ;;  %1147 = vmatmul.mubr.msk.bf16.gmra.mrb[40].mxu1 %vm478_vm1, %v1251_v63 }
  0x73   :  { %651 = vmatprep.mubr.bf16.mxu0 %v1252_v0  ;;  %1150 = vmatprep.mubr.msk.bf16.mxu1 %vm478_vm1, %v1254_v1 }
  0x7a   :  { %652 = vmatmul.mubr.bf16.gmra.mrb[44].mxu0 %v1255_v2  ;;  %1151 = vmatmul.mubr.msk.bf16.gmra.mrb[44].mxu1 %vm478_vm1, %v1256_v3 }
  0xf5   :  { %v1001_v4 = vpop.f32.mrb[0].mxu0  ;;  %v1073_v5 = vpop.f32.mrb[0].mxu1 }
  0xf6   :  { %v1002_v6 = vpop.f32.mrb[1].mxu0  ;;  %v1074_v7 = vpop.f32.mrb[1].mxu1 }
  0xf7   :  { %v1003_v8 = vadd.f32 %v1002_v6, %v1001_v4  ;;  %v1004_v9 = vpop.f32.mrb[2].mxu0  ;;  %v1521_v10 = vadd.f32 %v1074_v7, %v1073_v5  ;;  %v1076_v11 = vpop.f32.mrb[2].mxu1 }
  0xf8   :  { %v1005_v12 = vpop.f32.mrb[3].mxu0  ;;  %v1077_v13 = vpop.f32.mrb[3].mxu1 }
  0xf9   :  { %v1006_v14 = vadd.f32 %v1005_v12, %v1004_v9  ;;  %v1523_v15 = vadd.f32 %v1077_v13, %v1076_v11  ;;  %v566_v56 = vadd.f32 %v1003_v8, %v1540_v52 }
  0xfb   :  { %v569_v1 = vadd.f32 %v1006_v14, %v1540_v52 }
  0xfd   :  { %v1007_v16 = vpop.f32.mrb[4].mxu0  ;;  %v1079_v17 = vpop.f32.mrb[4].mxu1 }
  0xfe   :  { %v1008_v18 = vpop.f32.mrb[5].mxu0  ;;  %v1080_v19 = vpop.f32.mrb[5].mxu1 }
  0xff   :  { %v1009_v20 = vadd.f32 %v1008_v18, %v1007_v16  ;;  %v1010_v21 = vpop.f32.mrb[6].mxu0  ;;  %v1525_v22 = vadd.f32 %v1080_v19, %v1079_v17  ;;  %v1082_v23 = vpop.f32.mrb[6].mxu1 }
 0x100   :  { %v1011_v24 = vpop.f32.mrb[7].mxu0  ;;  %v1083_v25 = vpop.f32.mrb[7].mxu1 }
 0x101   :  { %v1012_v26 = vadd.f32 %v1011_v24, %v1010_v21  ;;  %v1527_v27 = vadd.f32 %v1083_v25, %v1082_v23  ;;  %v574_v53 = vadd.f32 %v1009_v20, %v1540_v52 }
 0x103   :  { %v577_v60 = vadd.f32 %v1012_v26, %v1540_v52 }
 0x105   :  { %v1013_v28 = vpop.f32.mrb[8].mxu0  ;;  %v1085_v29 = vpop.f32.mrb[8].mxu1 }
 0x106   :  { %v1014_v30 = vpop.f32.mrb[9].mxu0  ;;  %v1086_v31 = vpop.f32.mrb[9].mxu1 }
 0x107   :  { %v1015_v32 = vadd.f32 %v1014_v30, %v1013_v28  ;;  %v1016_v33 = vpop.f32.mrb[10].mxu0  ;;  %v1529_v34 = vadd.f32 %v1086_v31, %v1085_v29  ;;  %v1088_v35 = vpop.f32.mrb[10].mxu1 }
 0x108   :  { %v1017_v36 = vpop.f32.mrb[11].mxu0  ;;  %v1089_v37 = vpop.f32.mrb[11].mxu1 }
 0x109   :  { %v1018_v38 = vadd.f32 %v1017_v36, %v1016_v33  ;;  %v1531_v39 = vadd.f32 %v1089_v37, %v1088_v35  ;;  %v582_v11 = vadd.f32 %v1015_v32, %v1540_v52 }
 0x10b   :  { %v585_v21 = vadd.f32 %v1018_v38, %v1540_v52 }
 0x10d   :  { %v1019_v40 = vpop.f32.mrb[12].mxu0  ;;  %v1091_v41 = vpop.f32.mrb[12].mxu1 }
 0x10e   :  { %v1020_v42 = vpop.f32.mrb[13].mxu0  ;;  %v1092_v43 = vpop.f32.mrb[13].mxu1 }
 0x10f   :  { %v1021_v44 = vadd.f32 %v1020_v42, %v1019_v40  ;;  %v1022_v45 = vpop.f32.mrb[14].mxu0  ;;  %v1533_v46 = vadd.f32 %v1092_v43, %v1091_v41  ;;  %v1094_v47 = vpop.f32.mrb[14].mxu1 }
 0x110   :  { %v1023_v48 = vpop.f32.mrb[15].mxu0  ;;  %v1095_v49 = vpop.f32.mrb[15].mxu1 }
 0x111   :  { %v1024_v50 = vadd.f32 %v1023_v48, %v1022_v45  ;;  %v1535_v51 = vadd.f32 %v1095_v49, %v1094_v47  ;;  %v590_v7 = vadd.f32 %v1021_v44, %v1540_v52 }
 0x113   :  { %v593_v14 = vadd.f32 %v1024_v50, %v1540_v52 }
 0x115   :  { %v1025_v54 = vpop.f32.mrb[16].mxu0  ;;  %v1124_v55 = vpop.f32.mrb[16].mxu1 }
 0x116   :  { %v735_v57 = vadd.f32 %v1124_v55, %v574_v53  ;;  %v1026_v58 = vpop.f32.mrb[17].mxu0  ;;  %v726_v59 = vpop.f32.mrb[17].mxu1 }
 0x117   :  { %v1027_v61 = vadd.f32 %v1026_v58, %v1025_v54  ;;  %v727_v62 = vadd.f32 %v726_v59, %v566_v56  ;;  %v1028_v63 = vpop.f32.mrb[18].mxu0  ;;  %v1125_v0 = vpop.f32.mrb[18].mxu1 }
 0x118   :  { %855 = vst [vmem:[#allocation2 + $0x10] sm:$0xff] %v735_v57  ;;  %v738_v2 = vadd.f32 %v1125_v0, %v577_v60  ;;  %v1029_v3 = vpop.f32.mrb[19].mxu0  ;;  %v729_v4 = vpop.f32.mrb[19].mxu1 }
 0x119   :  { %853 = vst [vmem:[#allocation2] sm:$0xff] %v727_v62  ;;  %v1030_v5 = vadd.f32 %v1029_v3, %v1028_v63  ;;  %v730_v6 = vadd.f32 %v729_v4, %v569_v1  ;;  %v598_v32 = vadd.f32 %v1027_v61, %v1540_v52 }
 0x11a   :  { %856 = vst [vmem:[#allocation2 + $0x18] sm:$0xff] %v738_v2 }
 0x11b   :  { %854 = vst [vmem:[#allocation2 + $0x8] sm:$0xff] %v730_v6  ;;  %v601_v43 = vadd.f32 %v1030_v5, %v1540_v52 }
 0x11d   :  { %v1031_v8 = vpop.f32.mrb[20].mxu0  ;;  %v1128_v9 = vpop.f32.mrb[20].mxu1 }
 0x11e   :  { %v751_v12 = vadd.f32 %v1128_v9, %v590_v7  ;;  %v1032_v13 = vpop.f32.mrb[21].mxu0  ;;  %v742_v16 = vpop.f32.mrb[21].mxu1 }
 0x11f   :  { %v1033_v17 = vadd.f32 %v1032_v13, %v1031_v8  ;;  %v743_v18 = vadd.f32 %v742_v16, %v582_v11  ;;  %v1034_v19 = vpop.f32.mrb[22].mxu0  ;;  %v1129_v20 = vpop.f32.mrb[22].mxu1 }
 0x120   :  { %859 = vst [vmem:[#allocation2 + $0x30] sm:$0xff] %v751_v12  ;;  %v754_v23 = vadd.f32 %v1129_v20, %v593_v14  ;;  %v1035_v24 = vpop.f32.mrb[23].mxu0  ;;  %v745_v25 = vpop.f32.mrb[23].mxu1 }
 0x121   :  { %857 = vst [vmem:[#allocation2 + $0x20] sm:$0xff] %v743_v18  ;;  %v1036_v26 = vadd.f32 %v1035_v24, %v1034_v19  ;;  %v746_v28 = vadd.f32 %v745_v25, %v585_v21  ;;  %v606_v29 = vadd.f32 %v1033_v17, %v1540_v52 }
 0x122   :  { %860 = vst [vmem:[#allocation2 + $0x38] sm:$0xff] %v754_v23 }
 0x123   :  { %858 = vst [vmem:[#allocation2 + $0x28] sm:$0xff] %v746_v28  ;;  %v609_v37 = vadd.f32 %v1036_v26, %v1540_v52 }
 0x125   :  { %v1037_v30 = vpop.f32.mrb[24].mxu0  ;;  %v1132_v31 = vpop.f32.mrb[24].mxu1 }
 0x126   :  { %v767_v33 = vadd.f32 %v1132_v31, %v606_v29  ;;  %v1038_v35 = vpop.f32.mrb[25].mxu0  ;;  %v758_v36 = vpop.f32.mrb[25].mxu1 }
 0x127   :  { %v1039_v38 = vadd.f32 %v1038_v35, %v1037_v30  ;;  %v759_v40 = vadd.f32 %v758_v36, %v598_v32  ;;  %v1040_v41 = vpop.f32.mrb[26].mxu0  ;;  %v1133_v42 = vpop.f32.mrb[26].mxu1 }
 0x128   :  { %863 = vst [vmem:[#allocation2 + $0x50] sm:$0xff] %v767_v33  ;;  %v770_v44 = vadd.f32 %v1133_v42, %v609_v37  ;;  %v1041_v45 = vpop.f32.mrb[27].mxu0  ;;  %v761_v47 = vpop.f32.mrb[27].mxu1 }
 0x129   :  { %861 = vst [vmem:[#allocation2 + $0x40] sm:$0xff] %v759_v40  ;;  %v1042_v48 = vadd.f32 %v1041_v45, %v1040_v41  ;;  %v762_v49 = vadd.f32 %v761_v47, %v601_v43  ;;  %v614_v54 = vadd.f32 %v1039_v38, %v1540_v52  ;;  %v670_v38 = vadd.f32 %v1525_v22, %v1540_v52 }
 0x12a   :  { %864 = vst [vmem:[#allocation2 + $0x58] sm:$0xff] %v770_v44  ;;  %v662_v43 = vadd.f32 %v1521_v10, %v1540_v52  ;;  %v665_v22 = vadd.f32 %v1523_v15, %v1540_v52 }
 0x12b   :  { %862 = vst [vmem:[#allocation2 + $0x48] sm:$0xff] %v762_v49  ;;  %v617_v61 = vadd.f32 %v1042_v48, %v1540_v52  ;;  %v673_v48 = vadd.f32 %v1527_v27, %v1540_v52 }
 0x12d   :  { %v1043_v50 = vpop.f32.mrb[28].mxu0  ;;  %v1136_v53 = vpop.f32.mrb[28].mxu1 }
 0x12e   :  { %v1044_v55 = vpop.f32.mrb[29].mxu0  ;;  %v774_v56 = vpop.f32.mrb[29].mxu1 }
 0x12f   :  { %v1045_v57 = vadd.f32 %v1044_v55, %v1043_v50  ;;  %v775_v58 = vadd.f32 %v774_v56, %v614_v54  ;;  %v1046_v59 = vpop.f32.mrb[30].mxu0  ;;  %v1137_v60 = vpop.f32.mrb[30].mxu1 }
 0x130   :  { %v1047_v62 = vpop.f32.mrb[31].mxu0  ;;  %v777_v63 = vpop.f32.mrb[31].mxu1 }
 0x131   :  { %v622_v0 = vadd.f32 %v1045_v57, %v1540_v52  ;;  %865 = vst [vmem:[#allocation2 + $0x60] sm:$0xff] %v775_v58  ;;  %v1048_v1 = vadd.f32 %v1047_v62, %v1046_v59  ;;  %v778_v2 = vadd.f32 %v777_v63, %v617_v61  ;;  %v686_v61 = vadd.f32 %v1533_v46, %v1540_v52 }
 0x132   :  { %v681_v46 = vadd.f32 %v1531_v39, %v1540_v52 }
 0x133   :  { %v783_v3 = vadd.f32 %v1136_v53, %v622_v0  ;;  %v625_v4 = vadd.f32 %v1048_v1, %v1540_v52  ;;  %866 = vst [vmem:[#allocation2 + $0x68] sm:$0xff] %v778_v2  ;;  %v678_v0 = vadd.f32 %v1529_v34, %v1540_v52 }
 0x135   :  { %867 = vst [vmem:[#allocation2 + $0x70] sm:$0xff] %v783_v3  ;;  %v786_v5 = vadd.f32 %v1137_v60, %v625_v4  ;;  %v1049_v6 = vpop.f32.mrb[32].mxu0  ;;  %v1140_v7 = vpop.f32.mrb[32].mxu1  ;;  %v689_v4 = vadd.f32 %v1535_v51, %v1540_v52 }
 0x136   :  { %v1050_v8 = vpop.f32.mrb[33].mxu0  ;;  %v790_v9 = vpop.f32.mrb[33].mxu1 }
 0x137   :  { %868 = vst [vmem:[#allocation2 + $0x78] sm:$0xff] %v786_v5  ;;  %v1051_v11 = vadd.f32 %v1050_v8, %v1049_v6  ;;  %v1052_v12 = vpop.f32.mrb[34].mxu0  ;;  %v1141_v13 = vpop.f32.mrb[34].mxu1 }
 0x138   :  { %v1053_v16 = vpop.f32.mrb[35].mxu0  ;;  %v793_v14 = vpop.f32.mrb[35].mxu1 }
 0x139   :  { %v630_v17 = vadd.f32 %v1051_v11, %v1540_v52  ;;  %v1054_v18 = vadd.f32 %v1053_v16, %v1052_v12 }
 0x13b   :  { %v791_v19 = vadd.f32 %v790_v9, %v630_v17  ;;  %v633_v20 = vadd.f32 %v1054_v18, %v1540_v52 }
 0x13d   :  { %869 = vst [vmem:[#allocation2 + $0x80] sm:$0xff] %v791_v19  ;;  %v794_v21 = vadd.f32 %v793_v14, %v633_v20  ;;  %v1055_v23 = vpop.f32.mrb[36].mxu0  ;;  %v1560_v24 = vpop.f32.mrb[36].mxu1 }
 0x13e   :  { %v1056_v25 = vpop.f32.mrb[37].mxu0  ;;  %v806_v26 = vpop.f32.mrb[37].mxu1 }
 0x13f   :  { %870 = vst [vmem:[#allocation2 + $0x88] sm:$0xff] %v794_v21  ;;  %v1057_v28 = vadd.f32 %v1056_v25, %v1055_v23  ;;  %v1058_v29 = vpop.f32.mrb[38].mxu0  ;;  %v1562_v30 = vpop.f32.mrb[38].mxu1 }
 0x140   :  { %v1059_v31 = vpop.f32.mrb[39].mxu0  ;;  %v809_v32 = vpop.f32.mrb[39].mxu1 }
 0x141   :  { %v638_v33 = vadd.f32 %v1057_v28, %v1540_v52  ;;  %v1060_v35 = vadd.f32 %v1059_v31, %v1058_v29 }
 0x143   :  { %v799_v36 = vadd.f32 %v1140_v7, %v638_v33  ;;  %v641_v37 = vadd.f32 %v1060_v35, %v1540_v52 }
 0x145   :  { %871 = vst [vmem:[#allocation2 + $0x90] sm:$0xff] %v799_v36  ;;  %v802_v40 = vadd.f32 %v1141_v13, %v641_v37  ;;  %v1061_v41 = vpop.f32.mrb[40].mxu0  ;;  %v1148_v42 = vpop.f32.mrb[40].mxu1 }
 0x146   :  { %v831_v44 = vadd.f32 %v1148_v42, %v670_v38  ;;  %v1062_v45 = vpop.f32.mrb[41].mxu0  ;;  %v822_v47 = vpop.f32.mrb[41].mxu1 }
 0x147   :  { %872 = vst [vmem:[#allocation2 + $0x98] sm:$0xff] %v802_v40  ;;  %v1063_v49 = vadd.f32 %v1062_v45, %v1061_v41  ;;  %v823_v50 = vadd.f32 %v822_v47, %v662_v43  ;;  %v1064_v53 = vpop.f32.mrb[42].mxu0  ;;  %v1149_v54 = vpop.f32.mrb[42].mxu1 }
 0x148   :  { %879 = vst [vmem:[#allocation2 + $0xd0] sm:$0xff] %v831_v44  ;;  %v834_v55 = vadd.f32 %v1149_v54, %v673_v48  ;;  %v1065_v56 = vpop.f32.mrb[43].mxu0  ;;  %v825_v57 = vpop.f32.mrb[43].mxu1 }
 0x149   :  { %v646_v10 = vadd.f32 %v1063_v49, %v1540_v52  ;;  %877 = vst [vmem:[#allocation2 + $0xc0] sm:$0xff] %v823_v50  ;;  %v1066_v58 = vadd.f32 %v1065_v56, %v1064_v53  ;;  %v826_v59 = vadd.f32 %v825_v57, %v665_v22 }
 0x14a   :  { %880 = vst [vmem:[#allocation2 + $0xd8] sm:$0xff] %v834_v55 }
 0x14b   :  { %v807_v60 = vadd.f32 %v806_v26, %v646_v10  ;;  %v649_v27 = vadd.f32 %v1066_v58, %v1540_v52  ;;  %878 = vst [vmem:[#allocation2 + $0xc8] sm:$0xff] %v826_v59 }
 0x14d   :  { %873 = vst [vmem:[#allocation2 + $0xa0] sm:$0xff] %v807_v60  ;;  %v810_v62 = vadd.f32 %v809_v32, %v649_v27  ;;  %v1067_v15 = vpop.f32.mrb[44].mxu0  ;;  %v1152_v63 = vpop.f32.mrb[44].mxu1 }
 0x14e   :  { %v847_v1 = vadd.f32 %v1152_v63, %v686_v61  ;;  %v1068_v2 = vpop.f32.mrb[45].mxu0  ;;  %v838_v3 = vpop.f32.mrb[45].mxu1 }
 0x14f   :  { %874 = vst [vmem:[#allocation2 + $0xa8] sm:$0xff] %v810_v62  ;;  %v1069_v5 = vadd.f32 %v1068_v2, %v1067_v15  ;;  %v839_v6 = vadd.f32 %v838_v3, %v678_v0  ;;  %v1070_v7 = vpop.f32.mrb[46].mxu0  ;;  %v1153_v8 = vpop.f32.mrb[46].mxu1 }
 0x150   :  { %883 = vst [vmem:[#allocation2 + $0xf0] sm:$0xff] %v847_v1  ;;  %v850_v9 = vadd.f32 %v1153_v8, %v689_v4  ;;  %v1071_v11 = vpop.f32.mrb[47].mxu0  ;;  %v841_v12 = vpop.f32.mrb[47].mxu1 }
 0x151   :  { %v654_v34 = vadd.f32 %v1069_v5, %v1540_v52  ;;  %881 = vst [vmem:[#allocation2 + $0xe0] sm:$0xff] %v839_v6  ;;  %v1072_v13 = vadd.f32 %v1071_v11, %v1070_v7  ;;  %v842_v16 = vadd.f32 %v841_v12, %v681_v46 }
 0x152   :  { %884 = vst [vmem:[#allocation2 + $0xf8] sm:$0xff] %v850_v9 }
 0x153   :  { %v815_v51 = vadd.f32 %v1560_v24, %v654_v34  ;;  %v657_v14 = vadd.f32 %v1072_v13, %v1540_v52  ;;  %882 = vst [vmem:[#allocation2 + $0xe8] sm:$0xff] %v842_v16 }
 0x155   :  { %875 = vst [vmem:[#allocation2 + $0xb0] sm:$0xff] %v815_v51  ;;  %v818_v39 = vadd.f32 %v1562_v30, %v657_v14 }
 0x157   :  { %876 = vst [vmem:[#allocation2 + $0xb8] sm:$0xff] %v818_v39 }
 0x158   :  { %1268 = shalt.err (!%p1265_p4)
}
 0x159   :  { %s1269_s13 = scalar_lea.hbm %s1603_s3, 4096 }
 0x15a   :  { %p1270_p5 = scmp.ne.s32.totalorder %s1603_s3, %s1269_s13  ;;  %p1273_p6 = scmp.lt.u32.totalorder %s1269_s13, %s1603_s3 }
 0x15c   :  { %p1275_p7 = pnand %p1273_p6, %p1270_p5 }
 0x15e   :  { %1278 = shalt.err (!%p1275_p7)
}
 0x15f   :  { %s1282_s17 = smov 128   ;;  %s1283_s18 = smov 8  }
 0x160   :  { %896 = dma.vmem_to_hbm [thread:$0]  %s891_s9, 4096, %s1603_s3, [#allocation3], %s1282_s17, %s1282_s17, %s1283_s18  }
 0x161   :  { %1279 = dma.done.wait [#allocation3], 4096  }
 0x162   :  { %1280 = vsyncadd [#allocation3], 4294963200 }
 0x163   :  { %900 = vsyncpa [#allocation3], 1 }

</bundles_post_ra>
